<compile_context>
chip_gen: v7x
topology: tpu7x:2x2x1
jax: 0.10.0
libtpu: 0.0.40
codegen_flags: <defaults>
</compile_context>

<pallas_src>
import jax
import jax.numpy as jnp
from jax.experimental import pallas as pl
from jax.experimental.pallas import tpu as pltpu


# ----------------------------- hyper-params -----------------------------
BATCH = 8     # rows of x (fills the 8-sublane vreg dimension)
P = 64        # number of FM features (e.g. 2 * cnn_out_dim in DeepCoNN)
K = 8         # FM latent-factor dimension


# ----------------------------- Pallas kernel -----------------------------
def fm_kernel(x_ref, v_ref, w_ref, b_ref, o_ref):
    """Fused FactorizationMachine forward on one batch tile (all in VMEM).

    x_ref: (TB, P)  input-feature tile
    v_ref: (P, K)   FM factor matrix v
    w_ref: (P, 1)   linear weight (nn.Linear(p, 1).weight transposed)
    b_ref: (1, 1)   linear bias
    o_ref: (TB, 1)  output tile
    """
    x = x_ref[...]                                                          # one VMEM load
    v = v_ref[...]
    # Three small MXU matmuls, all f32-accumulated.
    xv   = jnp.dot(x,     v,         preferred_element_type=jnp.float32)    # (TB, K)
    x2v2 = jnp.dot(x * x, v * v,     preferred_element_type=jnp.float32)    # (TB, K)
    lin  = jnp.dot(x,     w_ref[...], preferred_element_type=jnp.float32)   # (TB, 1)
    # Pairwise-interaction term: one cross-lane (XLU) reduction.
    pair = jnp.sum(xv * xv - x2v2, axis=1, keepdims=True)                   # (TB, 1)
    # Dropout is identity in eval mode.
    o_ref[...] = lin + b_ref[0, 0] + 0.5 * pair


# ----------------------------- wrapper -----------------------------
def fm_forward(x, v, lin_w, lin_b):
    """x: (B, P), v: (P, K), lin_w: (P,), lin_b: (1,) -> (B, 1)."""
    B, Pdim = x.shape
    Pv, Kdim = v.shape
    assert Pv == Pdim

    # Batch tile: full batch if small, else 128-row tiles (8-sublane aligned).
    TB = B if B <= 128 else 128
    assert B % TB == 0, "batch must be a multiple of the tile size"
    grid = (B // TB,)

    w2 = lin_w.reshape(Pdim, 1)
    b2 = lin_b.reshape(1, 1)

    flops = 2 * B * Pdim * (2 * Kdim + 1) + 6 * B * Kdim + 3 * B
    bytes_accessed = 4 * (B * Pdim + Pdim * Kdim + Pdim + 1 + B)

    return pl.pallas_call(
        fm_kernel,
        out_shape=jax.ShapeDtypeStruct((B, 1), jnp.float32),
        grid_spec=pltpu.PrefetchScalarGridSpec(
            num_scalar_prefetch=0,
            grid=grid,
            in_specs=[
                pl.BlockSpec((TB, Pdim), lambda i: (i, 0)),      # x tile
                pl.BlockSpec((Pdim, Kdim), lambda i: (0, 0)),    # v
                pl.BlockSpec((Pdim, 1), lambda i: (0, 0)),       # linear weight
                pl.BlockSpec((1, 1), lambda i: (0, 0)),          # linear bias
            ],
            out_specs=pl.BlockSpec((TB, 1), lambda i: (i, 0)),
        ),
        compiler_params=pltpu.CompilerParams(
            dimension_semantics=("parallel",)),
        cost_estimate=pl.CostEstimate(
            flops=flops, transcendentals=0, bytes_accessed=bytes_accessed),
    )(x, v, w2, b2)


# ----------------------------- reference (pure JAX) -----------------------------
def fm_forward_ref(x, v, lin_w, lin_b):
    linear_part = x @ lin_w.reshape(-1, 1) + lin_b.reshape(1, 1)
    inter_part1 = (x @ v) ** 2
    inter_part2 = (x * x) @ (v * v)
    pair_interactions = jnp.sum(inter_part1 - inter_part2, axis=1, keepdims=True)
    return linear_part + 0.5 * pair_interactions


# ----------------------------- main -----------------------------
if __name__ == "__main__":
    key = jax.random.PRNGKey(0)
    k_x, k_v, k_w, k_b = jax.random.split(key, 4)

    # x: (batch, p) FM input features.
    x = jax.random.normal(k_x, (BATCH, P), dtype=jnp.float32)

    # Parameters mirroring the PyTorch module:
    #   self.v = nn.Parameter(torch.rand(p, k) / 10)
    #   self.linear = nn.Linear(p, 1, bias=True)
    v = jax.random.uniform(k_v, (P, K), dtype=jnp.float32) / 10.0
    lin_w = jax.random.normal(k_w, (P,), dtype=jnp.float32) * 0.1
    lin_b = jax.random.normal(k_b, (1,), dtype=jnp.float32) * 0.1

    out = jax.block_until_ready(fm_forward(x, v, lin_w, lin_b))
    ref = jax.block_until_ready(fm_forward_ref(x, v, lin_w, lin_b))

    assert out.shape == (BATCH, 1), out.shape
    assert jnp.allclose(out, ref, atol=1e-5, rtol=1e-5), float(jnp.max(jnp.abs(out - ref)))

    print("KERNEL_OK")
</pallas_src>

<mosaic_0001>
module attributes {stable_mosaic.version = 11 : i64} {
  func.func @fm_kernel(%arg0: i32, %arg1: memref<8x64xf32, #tpu.memory_space<vmem>>, %arg2: memref<64x8xf32, #tpu.memory_space<vmem>>, %arg3: memref<64x1xf32, #tpu.memory_space<vmem>>, %arg4: memref<1x1xf32, #tpu.memory_space<vmem>>, %arg5: memref<8x1xf32, #tpu.memory_space<vmem>>) attributes {dimension_semantics = [#tpu.dimension_semantics<parallel>], iteration_bounds = array<i64: 1>, scalar_prefetch = 0 : i64, scratch_operands = 0 : i64, tpu.core_type = #tpu.core_type<tc>, window_params = [{transform_indices = @transform_0, window_bounds = array<i64: 8, 64>}, {pipeline_mode = #tpu.pipeline_mode<synchronous>, transform_indices = @transform_1, window_bounds = array<i64: 64, 8>}, {pipeline_mode = #tpu.pipeline_mode<synchronous>, transform_indices = @transform_2, window_bounds = array<i64: 64, 1>}, {pipeline_mode = #tpu.pipeline_mode<synchronous>, transform_indices = @transform_3, window_bounds = array<i64: 1, 1>}, {transform_indices = @transform_4, window_bounds = array<i64: 8, 1>}]} {
    %c0 = arith.constant 0 : index
    %c0_0 = arith.constant 0 : index
    %0 = vector.load %arg1[%c0, %c0_0] : memref<8x64xf32, #tpu.memory_space<vmem>>, vector<8x64xf32>
    %c0_1 = arith.constant 0 : index
    %c0_2 = arith.constant 0 : index
    %1 = vector.load %arg2[%c0_1, %c0_2] : memref<64x8xf32, #tpu.memory_space<vmem>>, vector<64x8xf32>
    %cst = arith.constant dense<0.000000e+00> : vector<8x8xf32>
    %2 = tpu.matmul %0, %1, %cst {dimension_numbers = #tpu.dot_dimension_numbers<[1], [0], [0], [1], [0, 0, 1, 1], [], []>} : vector<8x64xf32>, vector<64x8xf32>, vector<8x8xf32> -> vector<8x8xf32>
    %3 = arith.mulf %0, %0 : vector<8x64xf32>
    %4 = arith.mulf %1, %1 : vector<64x8xf32>
    %cst_3 = arith.constant dense<0.000000e+00> : vector<8x8xf32>
    %5 = tpu.matmul %3, %4, %cst_3 {dimension_numbers = #tpu.dot_dimension_numbers<[1], [0], [0], [1], [0, 0, 1, 1], [], []>} : vector<8x64xf32>, vector<64x8xf32>, vector<8x8xf32> -> vector<8x8xf32>
    %c0_4 = arith.constant 0 : index
    %c0_5 = arith.constant 0 : index
    %6 = vector.load %arg3[%c0_4, %c0_5] : memref<64x1xf32, #tpu.memory_space<vmem>>, vector<64x1xf32>
    %cst_6 = arith.constant dense<0.000000e+00> : vector<8x1xf32>
    %7 = tpu.matmul %0, %6, %cst_6 {dimension_numbers = #tpu.dot_dimension_numbers<[1], [0], [0], [1], [0, 0, 1, 1], [], []>} : vector<8x64xf32>, vector<64x1xf32>, vector<8x1xf32> -> vector<8x1xf32>
    %8 = arith.mulf %2, %2 : vector<8x8xf32>
    %9 = arith.subf %8, %5 : vector<8x8xf32>
    %cst_7 = arith.constant dense<0.000000e+00> : vector<8xf32>
    %10 = vector.multi_reduction <add>, %9, %cst_7 [1] : vector<8x8xf32> to vector<8xf32>
    %11 = vector.shape_cast %10 : vector<8xf32> to vector<8x1xf32>
    %c0_8 = arith.constant 0 : index
    %c0_9 = arith.constant 0 : index
    %12 = vector.load %arg4[%c0_8, %c0_9] : memref<1x1xf32, #tpu.memory_space<vmem>>, vector<1x1xf32>
    %13 = vector.extract %12[0, 0] : f32 from vector<1x1xf32>
    %14 = vector.broadcast %13 : f32 to vector<8x1xf32>
    %15 = arith.addf %7, %14 : vector<8x1xf32>
    %cst_10 = arith.constant 5.000000e-01 : f32
    %16 = vector.broadcast %cst_10 : f32 to vector<8x1xf32>
    %17 = arith.mulf %16, %11 : vector<8x1xf32>
    %18 = arith.addf %15, %17 : vector<8x1xf32>
    %c0_11 = arith.constant 0 : index
    %c0_12 = arith.constant 0 : index
    %19 = vector.load %arg5[%c0_11, %c0_12] : memref<8x1xf32, #tpu.memory_space<vmem>>, vector<8x1xf32>
    tpu.vector_store %arg5[%c0_11, %c0_12], %18 {strides = array<i32>} : memref<8x1xf32, #tpu.memory_space<vmem>>, vector<8x1xf32>,
    return
  }
  func.func @transform_0(%arg0: i32) -> (i32, i32) {
    %c0_i32 = arith.constant 0 : i32
    %c0_i32_0 = arith.constant 0 : i32
    return %arg0, %c0_i32 : i32, i32
  }
  func.func @transform_1(%arg0: i32) -> (i32, i32) {
    %c0_i32 = arith.constant 0 : i32
    %c0_i32_0 = arith.constant 0 : i32
    %c0_i32_1 = arith.constant 0 : i32
    return %c0_i32, %c0_i32_0 : i32, i32
  }
  func.func @transform_2(%arg0: i32) -> (i32, i32) {
    %c0_i32 = arith.constant 0 : i32
    %c0_i32_0 = arith.constant 0 : i32
    %c0_i32_1 = arith.constant 0 : i32
    return %c0_i32, %c0_i32_0 : i32, i32
  }
  func.func @transform_3(%arg0: i32) -> (i32, i32) {
    %c0_i32 = arith.constant 0 : i32
    %c0_i32_0 = arith.constant 0 : i32
    %c0_i32_1 = arith.constant 0 : i32
    return %c0_i32, %c0_i32_0 : i32, i32
  }
  func.func @transform_4(%arg0: i32) -> (i32, i32) {
    %c0_i32 = arith.constant 0 : i32
    %c0_i32_0 = arith.constant 0 : i32
    return %arg0, %c0_i32 : i32, i32
  }
}

</mosaic_0001>

<bundles_post_ra>
// kernel: tpu_custom_call.1
= control target key start
LH: loop header
LB: loop body
LE: loop exit
PB: predicated region body
PF: predicated region fallthrough
CT: control target
= control target key end

     0   :  { %v407_v0 = vmov 0.0|0.0   ;;  %vm408_vm0 = vmmov 0   ;;  %v409_v9 = vmov 0.0   ;;  %vm28_vm1 = vcmask 523264   ;;  %s510_s1 = inlined_call_operand.vmem [shape: f32[64,8], index: 1, kind: input, shape index: {}]   ;;  %s511_s2 = inlined_call_operand.vmem [shape: f32[64,1], index: 2, kind: input, shape index: {}]   ;;  %s512_s0 = inlined_call_operand.vmem [shape: f32[8,64], index: 0, kind: input, shape index: {}]   ;;  %s513_s3 = inlined_call_operand.<no memory space> [shape: f32[1,1], index: 3, kind: input, shape index: {}]   ;;  %s514_s4 = inlined_call_operand.vmem [shape: f32[8,1], index: 4, kind: output, shape index: {}]  }
   0x1   :  { %366 = vmatprep.subr.bf16.mxu0 %v407_v0  ;;  %v20_v1 = vld [vmem:[%s510_s1] sm:$0xff]  ;;  %v21_v2 = vld [vmem:[%s510_s1 + $0x8] sm:$0xff]  ;;  %378 = vmatprep.subr.bf16.mxu1 %v407_v0  ;;  %v22_v3 = vld [vmem:[%s510_s1 + $0x10] sm:$0xff]  ;;  %v9_v40 = vstv %s513_s3  ;;  %vm194_vm2 = vcmask 64512   ;;  %vm273_vm3 = vcmask 7168  }
   0x2   :  { %v367_v4 = vpack.c.bf16 %v21_v2, %v20_v1  ;;  %v103_v5 = vmul.f32 %v20_v1, %v20_v1  ;;  %v104_v6 = vmul.f32 %v21_v2, %v21_v2  ;;  %v23_v7 = vld [vmem:[%s510_s1 + $0x18] sm:$0xff]  ;;  %v105_v8 = vmul.f32 %v22_v3, %v22_v3  ;;  %325 = vmatprep.mubr.msk.f32.mxu0 %vm408_vm0, %v409_v9  ;;  %v24_v11 = vld [vmem:[%s510_s1 + $0x20] sm:$0xff]  ;;  %v25_v12 = vld [vmem:[%s510_s1 + $0x28] sm:$0xff] }
   0x3   :  { %v106_v10 = vmul.f32 %v23_v7, %v23_v7  ;;  %344 = vmatprep.mubr.msk.f32.mxu1 %vm408_vm0, %v409_v9  ;;  %v370_v14 = vpack.c.bf16 %v23_v7, %v22_v3  ;;  %v107_v16 = vmul.f32 %v24_v11, %v24_v11  ;;  %v108_v17 = vmul.f32 %v25_v12, %v25_v12  ;;  %v26_v18 = vld [vmem:[%s510_s1 + $0x30] sm:$0xff]  ;;  %v27_v19 = vld [vmem:[%s510_s1 + $0x38] sm:$0xff]  ;;  %v184_v25 = vld [vmem:[%s511_s2] sm:$0xff] }
   0x4   :  { %368 = vmatpush3.bf16.msra.mxu0 %v367_v4  ;;  %v379_v13 = vpack.c.bf16 %v104_v6, %v103_v5  ;;  %v373_v20 = vpack.c.bf16 %v25_v12, %v24_v11  ;;  %v109_v22 = vmul.f32 %v26_v18, %v26_v18  ;;  %v110_v23 = vmul.f32 %v27_v19, %v27_v19  ;;  %v185_v26 = vld [vmem:[%s511_s2 + $0x8] sm:$0xff]  ;;  %v19_v28 = vld [vmem:[%s512_s0] sm:$0xff]  ;;  %v186_v31 = vld [vmem:[%s511_s2 + $0x10] sm:$0xff] }
   0x5   :  { %369 = vmatprep.subr.bf16.mxu0 %v407_v0  ;;  %v382_v15 = vpack.c.bf16 %v106_v10, %v105_v8  ;;  %v385_v21 = vpack.c.bf16 %v108_v17, %v107_v16  ;;  %v376_v24 = vpack.c.bf16 %v27_v19, %v26_v18  ;;  %v391_v29 = vpack.c.bf16 %v185_v26, %v184_v25  ;;  %v187_v32 = vld [vmem:[%s511_s2 + $0x18] sm:$0xff]  ;;  %v188_v34 = vld [vmem:[%s511_s2 + $0x20] sm:$0xff]  ;;  %v189_v35 = vld [vmem:[%s511_s2 + $0x28] sm:$0xff] }
   0x6   :  { %380 = vmatpush3.bf16.msra.mxu1 %v379_v13  ;;  %v388_v27 = vpack.c.bf16 %v110_v23, %v109_v22  ;;  %v102_v30 = vmul.f32 %v19_v28, %v19_v28  ;;  %v394_v33 = vpack.c.bf16 %v187_v32, %v186_v31  ;;  %v397_v36 = vpack.c.bf16 %v189_v35, %v188_v34  ;;  %v190_v37 = vld [vmem:[%s511_s2 + $0x30] sm:$0xff]  ;;  %v191_v38 = vld [vmem:[%s511_s2 + $0x38] sm:$0xff] }
   0x7   :  { %381 = vmatprep.subr.bf16.mxu1 %v407_v0  ;;  %v400_v39 = vpack.c.bf16 %v191_v38, %v190_v37  ;;  %10 = vst [vmem:[#allocation2] sm:$0x1] %v9_v40 }
   0x8   :  { %371 = vmatpush3.bf16.msra.mxu0 %v370_v14 }
   0x9   :  { %372 = vmatprep.subr.bf16.mxu0 %v407_v0 }
   0xa   :  { %383 = vmatpush3.bf16.msra.mxu1 %v382_v15 }
   0xb   :  { %384 = vmatprep.subr.bf16.mxu1 %v407_v0 }
   0xc   :  { %374 = vmatpush3.bf16.msra.mxu0 %v373_v20 }
   0xd   :  { %375 = vmatprep.subr.bf16.mxu0 %v407_v0 }
   0xe   :  { %386 = vmatpush3.bf16.msra.mxu1 %v385_v21  ;;  %v198_v41 = vld [vmem:[#allocation2] sm:$0x1] }
   0xf   :  { %387 = vmatprep.subr.bf16.mxu1 %v407_v0  ;;  %402 = vpush %v198_v41 }
  0x10   :  { %377 = vmatpush3.bf16.msra.mxu0 %v376_v24 }
  0x11   :  { %390 = vmatprep.subr.bf16.mxu0 %v407_v0 }
  0x12   :  { %389 = vmatpush3.bf16.msra.mxu1 %v388_v27 }
  0x13   :  { %326 = vmatmul.mubr.msk.f32.vlgmr.msra.gmra.mrb[0].mxu0 %vm28_vm1, %v19_v28 }
  0x14   :  { %392 = vmatpush3.bf16.msra.mxu0 %v391_v29  ;;  %363 = vmatprep.mubr.msk.f32.mxu0 %vm408_vm0, %v409_v9 }
  0x15   :  { %345 = vmatmul.mubr.msk.f32.vlgmr.msra.gmra.mrb[0].mxu1 %vm28_vm1, %v102_v30  ;;  %393 = vmatprep.subr.bf16.mxu0 %v407_v0 }
  0x18   :  { %395 = vmatpush3.bf16.msra.mxu0 %v394_v33 }
  0x19   :  { %396 = vmatprep.subr.bf16.mxu0 %v407_v0 }
  0x1c   :  { %398 = vmatpush3.bf16.msra.mxu0 %v397_v36 }
  0x1d   :  { %399 = vmatprep.subr.bf16.mxu0 %v407_v0 }
  0x20   :  { %401 = vmatpush3.bf16.msra.mxu0 %v400_v39 }
  0x23   :  { %364 = vmatmul.mubr.msk.f32.vlgmr.msra.gmra.mrb[2].mxu0 %vm28_vm1, %v19_v28 }
  0x40   :  { %s403_s2 = spop %402 }
  0x41   :  { %v200_v51 = vstv %s403_s2 }
  0xe6   :  { %v98_v42 = vpop.f32.mrb[0].mxu0 }
  0xe7   :  { %v192_v43 = vmul.f32 %v98_v42, %v98_v42  ;;  %v327_v44 = vpop.f32.mrb[1].mxu0 }
  0xe8   :  { %v180_v45 = vpop.f32.mrb[0].mxu1 }
  0xe9   :  { %v193_v46 = vsub.f32 %v192_v43, %v180_v45  ;;  %v346_v47 = vpop.f32.mrb[1].mxu1 }
  0xeb   :  { %v195_v48 = vsel %vm194_vm2, %v193_v46, 0.0 }
  0xec   :  { %196 = vadd.xlane.f32.xlu0 %v195_v48 }
  0xf6   :  { %v267_v49 = vpop.f32.mrb[2].mxu0 }
  0xf7   :  { %v365_v50 = vpop.f32.mrb[3].mxu0  ;;  %v268_v52 = vadd.f32 %v267_v49, %v200_v51 }
 0x179   :  { %v197_v53 = vpop.xlane.xlu0 %196 }
 0x17a   :  { %v271_v54 = vmul.f32 0.5, %v197_v53 }
 0x17c   :  { %v272_v55 = vadd.f32 %v271_v54, %v268_v52 }
 0x17e   :  { %274 = vst.msk [vmem:[%s514_s4] sm:$0xff] %vm273_vm3, %v272_v55 }

</bundles_post_ra>
